<compile_context>
chip_gen: v6e
topology: v6e:2x2x1
jax: 0.10.0
libtpu: 0.0.40
codegen_flags: <defaults>
</compile_context>

<pallas_src>
import jax
import jax.numpy as jnp
from jax.experimental import pallas as pl
from jax.experimental.pallas import tpu as pltpu

LANE = 128
SUBLANE = 8
MAX_TB = 1024                    # max batch rows per grid step
X_TILE_BYTES = 8 * 1024 * 1024   # per-buffer VMEM budget for the f32 x tile


def _round_up(n, m):
    return ((n + m - 1) // m) * m


def _classifier_kernel(x_ref,
                       we_ref, be_ref,
                       w1_ref, b1_ref,
                       w2_ref, b2_ref,
                       w3_ref, b3_ref,
                       o_ref):
    """One batch tile: fused encoder (flatten+linear+relu) + MLP head.

    x_ref:  [TB, d_in]   f32 (cast to bf16 in-register before the dot)
    w*_ref: [in, out_p]  bf16 (output widths zero-padded to 128)
    b*_ref: [1,  out_p]  f32  (zero-padded)
    o_ref:  [TB, nc_p]   bf16
    """
    x = x_ref[...].astype(jnp.bfloat16)

    # Encoder: Linear(d_in, num_features) + ReLU   (f32 accumulation)
    z = jnp.dot(x, we_ref[...], preferred_element_type=jnp.float32) + be_ref[...]
    z = jnp.maximum(z, 0.0)

    # Linear(num_features, 64) + ReLU
    h1 = jnp.dot(z.astype(jnp.bfloat16), w1_ref[...],
                 preferred_element_type=jnp.float32) + b1_ref[...]
    h1 = jnp.maximum(h1, 0.0)

    # Linear(64, 32) + ReLU
    h2 = jnp.dot(h1.astype(jnp.bfloat16), w2_ref[...],
                 preferred_element_type=jnp.float32) + b2_ref[...]
    h2 = jnp.maximum(h2, 0.0)

    # Linear(32, num_classes) + Tanh
    logits = jnp.dot(h2.astype(jnp.bfloat16), w3_ref[...],
                     preferred_element_type=jnp.float32) + b3_ref[...]
    o_ref[...] = jnp.tanh(logits).astype(o_ref.dtype)


def prepare_params(params):
    """One-time prep: transpose PyTorch [out,in] -> [in,out], zero-pad the
    OUTPUT widths to multiples of 128 (K of the encoder stays at d_in),
    cast weights to bf16, biases to f32 [1, out_p]."""
    nf, d_in = params["enc_w"].shape
    nc = params["fc3_w"].shape[0]
    nf_p = _round_up(nf, LANE)
    h1_p = _round_up(64, LANE)
    h2_p = _round_up(32, LANE)
    nc_p = _round_up(nc, LANE)

    def prep_w(w, rows_p, cols_p):
        wt = w.T  # [in, out]
        wt = jnp.pad(wt, ((0, rows_p - wt.shape[0]), (0, cols_p - wt.shape[1])))
        return wt.astype(jnp.bfloat16)

    def prep_b(b, cols_p):
        return jnp.pad(b, (0, cols_p - b.shape[0]))[None, :].astype(jnp.float32)

    return {
        "we": prep_w(params["enc_w"], d_in, nf_p),   # K = d_in, not padded
        "be": prep_b(params["enc_b"], nf_p),
        "w1": prep_w(params["fc1_w"], nf_p, h1_p),
        "b1": prep_b(params["fc1_b"], h1_p),
        "w2": prep_w(params["fc2_w"], h1_p, h2_p),
        "b2": prep_b(params["fc2_b"], h2_p),
        "w3": prep_w(params["fc3_w"], h2_p, nc_p),
        "b3": prep_b(params["fc3_b"], nc_p),
    }


def classifier_forward(x_nchw, prep, num_classes):
    """x_nchw: [B, C, H, W] float32. prep: output of prepare_params."""
    B = x_nchw.shape[0]
    x_flat = x_nchw.reshape(B, -1)                  # free reshape, no HBM copy
    if x_flat.dtype != jnp.float32:
        x_flat = x_flat.astype(jnp.float32)
    d_in = x_flat.shape[1]

    nf_p = prep["we"].shape[1]
    h1_p = prep["w1"].shape[1]
    h2_p = prep["w2"].shape[1]
    nc_p = prep["w3"].shape[1]
    assert prep["we"].shape[0] == d_in

    # Batch tiling:
    #  * cap TB at ~ceil(B/2) (rounded to 8) so v7x's two TensorCores each get
    #    at least one grid step once B is large (v5e/v6e unaffected),
    #  * cap TB by the per-buffer VMEM budget for the double-buffered f32 tile,
    #  * if TB >= B, use a single full-extent block (exempt from the 8-row rule).
    half = _round_up(-(-_round_up(B, SUBLANE) // 2), SUBLANE)
    vmem_cap = max(SUBLANE, (X_TILE_BYTES // (d_in * 4)) // SUBLANE * SUBLANE)
    TB = min(MAX_TB, half, vmem_cap)
    if TB >= B:
        TB = B
    grid = (pl.cdiv(B, TB),)

    const2 = lambda i: (0, 0)
    in_specs = [
        pl.BlockSpec((TB, d_in), lambda i: (i, 0)),       # x: tiled over batch
        pl.BlockSpec(prep["we"].shape, const2),           # weights/biases resident
        pl.BlockSpec(prep["be"].shape, const2),
        pl.BlockSpec(prep["w1"].shape, const2),
        pl.BlockSpec(prep["b1"].shape, const2),
        pl.BlockSpec(prep["w2"].shape, const2),
        pl.BlockSpec(prep["w2"].shape[0:0] + prep["b2"].shape, const2),
        pl.BlockSpec(prep["w3"].shape, const2),
        pl.BlockSpec(prep["b3"].shape, const2),
    ]
    # (b2 spec above is just its full shape; keep it explicit)
    in_specs[6] = pl.BlockSpec(prep["b2"].shape, const2)
    out_spec = pl.BlockSpec((TB, nc_p), lambda i: (i, 0))

    rows = grid[0] * TB
    flops = 2 * rows * (d_in * nf_p + nf_p * h1_p + h1_p * h2_p + h2_p * nc_p)
    weight_bytes = sum(int(prep[k].size) * prep[k].dtype.itemsize for k in prep)
    bytes_accessed = B * d_in * 4 + B * nc_p * 2 + weight_bytes

    # TODO(synk): for very large d_in (e.g. 3x224x224 ~ 150K) add a second
    # "arbitrary" grid axis tiling K of the encoder matmul with an f32 VMEM
    # accumulator (pl.when init/finalize) so the per-step x tile stays bounded.
    out_padded = pl.pallas_call(
        _classifier_kernel,
        out_shape=jax.ShapeDtypeStruct((B, nc_p), jnp.bfloat16),
        grid=grid,
        in_specs=in_specs,
        out_specs=out_spec,
        compiler_params=pltpu.CompilerParams(
            dimension_semantics=("parallel",),
            vmem_limit_bytes=32 * 1024 * 1024),
        cost_estimate=pl.CostEstimate(
            flops=flops,
            transcendentals=B * num_classes,
            bytes_accessed=bytes_accessed),
    )(x_flat, prep["we"], prep["be"], prep["w1"], prep["b1"],
      prep["w2"], prep["b2"], prep["w3"], prep["b3"])

    return out_padded[:B, :num_classes].astype(jnp.float32)


def _uniform(key, shape, fan_in):
    bound = 1.0 / jnp.sqrt(jnp.float32(fan_in))
    return jax.random.uniform(key, shape, jnp.float32, -bound, bound)


def init_params(key, d_in, num_features, num_classes):
    ks = jax.random.split(key, 8)
    return {
        "enc_w": _uniform(ks[0], (num_features, d_in), d_in),
        "enc_b": _uniform(ks[1], (num_features,), d_in),
        "fc1_w": _uniform(ks[2], (64, num_features), num_features),
        "fc1_b": _uniform(ks[3], (64,), num_features),
        "fc2_w": _uniform(ks[4], (32, 64), 64),
        "fc2_b": _uniform(ks[5], (32,), 64),
        "fc3_w": _uniform(ks[6], (num_classes, 32), 32),
        "fc3_b": _uniform(ks[7], (num_classes,), 32),
    }


def _reference_forward(x_nchw, params):
    """Pure-JAX f32 reference matching the PyTorch module semantics."""
    x = x_nchw.reshape(x_nchw.shape[0], -1)
    z = jnp.maximum(x @ params["enc_w"].T + params["enc_b"], 0.0)
    h1 = jnp.maximum(z @ params["fc1_w"].T + params["fc1_b"], 0.0)
    h2 = jnp.maximum(h1 @ params["fc2_w"].T + params["fc2_b"], 0.0)
    return jnp.tanh(h2 @ params["fc3_w"].T + params["fc3_b"])


if __name__ == "__main__":
    key = jax.random.PRNGKey(0)
    k_x, k_p = jax.random.split(key)

    B, C, H, W = 2, 4, 16, 16
    num_features, num_classes = 32, 10
    d_in = C * H * W

    x = jax.random.normal(k_x, (B, C, H, W), jnp.float32)
    params = init_params(k_p, d_in, num_features, num_classes)
    prep = prepare_params(params)

    out = jax.block_until_ready(classifier_forward(x, prep, num_classes))
    ref = _reference_forward(x, params)

    assert out.shape == (B, num_classes)
    # bf16 inputs/weights/output with f32 accumulation -> loosened tolerance.
    assert jnp.allclose(out, ref, atol=2e-2, rtol=2e-2), float(jnp.max(jnp.abs(out - ref)))
    print("KERNEL_OK")
</pallas_src>

<mosaic_0001>
module attributes {stable_mosaic.version = 11 : i64} {
  func.func @_classifier_kernel(%arg0: i32, %arg1: memref<2x1024xf32, #tpu.memory_space<vmem>>, %arg2: memref<1024x128xbf16, #tpu.memory_space<vmem>>, %arg3: memref<1x128xf32, #tpu.memory_space<vmem>>, %arg4: memref<128x128xbf16, #tpu.memory_space<vmem>>, %arg5: memref<1x128xf32, #tpu.memory_space<vmem>>, %arg6: memref<128x128xbf16, #tpu.memory_space<vmem>>, %arg7: memref<1x128xf32, #tpu.memory_space<vmem>>, %arg8: memref<128x128xbf16, #tpu.memory_space<vmem>>, %arg9: memref<1x128xf32, #tpu.memory_space<vmem>>, %arg10: memref<2x128xbf16, #tpu.memory_space<vmem>>) attributes {dimension_semantics = [#tpu.dimension_semantics<parallel>], iteration_bounds = array<i64: 1>, scalar_prefetch = 0 : i64, scratch_operands = 0 : i64, tpu.core_type = #tpu.core_type<tc>, window_params = [{transform_indices = @transform_0, window_bounds = array<i64: 2, 1024>}, {pipeline_mode = #tpu.pipeline_mode<synchronous>, transform_indices = @transform_1, window_bounds = array<i64: 1024, 128>}, {pipeline_mode = #tpu.pipeline_mode<synchronous>, transform_indices = @transform_2, window_bounds = array<i64: 1, 128>}, {pipeline_mode = #tpu.pipeline_mode<synchronous>, transform_indices = @transform_3, window_bounds = array<i64: 128, 128>}, {pipeline_mode = #tpu.pipeline_mode<synchronous>, transform_indices = @transform_4, window_bounds = array<i64: 1, 128>}, {pipeline_mode = #tpu.pipeline_mode<synchronous>, transform_indices = @transform_5, window_bounds = array<i64: 128, 128>}, {pipeline_mode = #tpu.pipeline_mode<synchronous>, transform_indices = @transform_6, window_bounds = array<i64: 1, 128>}, {pipeline_mode = #tpu.pipeline_mode<synchronous>, transform_indices = @transform_7, window_bounds = array<i64: 128, 128>}, {pipeline_mode = #tpu.pipeline_mode<synchronous>, transform_indices = @transform_8, window_bounds = array<i64: 1, 128>}, {transform_indices = @transform_9, window_bounds = array<i64: 2, 128>}]} {
    %c0 = arith.constant 0 : index
    %c0_0 = arith.constant 0 : index
    %0 = vector.load %arg1[%c0, %c0_0] : memref<2x1024xf32, #tpu.memory_space<vmem>>, vector<2x1024xf32>
    %1 = arith.truncf %0 : vector<2x1024xf32> to vector<2x1024xbf16>
    %c0_1 = arith.constant 0 : index
    %c0_2 = arith.constant 0 : index
    %2 = vector.load %arg2[%c0_1, %c0_2] : memref<1024x128xbf16, #tpu.memory_space<vmem>>, vector<1024x128xbf16>
    %cst = arith.constant dense<0.000000e+00> : vector<2x128xf32>
    %3 = tpu.matmul %1, %2, %cst {dimension_numbers = #tpu.dot_dimension_numbers<[1], [0], [0], [1], [0, 0, 1, 1], [], []>} : vector<2x1024xbf16>, vector<1024x128xbf16>, vector<2x128xf32> -> vector<2x128xf32>
    %c0_3 = arith.constant 0 : index
    %c0_4 = arith.constant 0 : index
    %4 = vector.load %arg3[%c0_3, %c0_4] : memref<1x128xf32, #tpu.memory_space<vmem>>, vector<1x128xf32>
    %5 = vector.broadcast %4 : vector<1x128xf32> to vector<2x128xf32>
    %6 = arith.addf %3, %5 : vector<2x128xf32>
    %cst_5 = arith.constant 0.000000e+00 : f32
    %7 = vector.broadcast %cst_5 : f32 to vector<2x128xf32>
    %8 = arith.maximumf %6, %7 : vector<2x128xf32>
    %9 = arith.truncf %8 : vector<2x128xf32> to vector<2x128xbf16>
    %c0_6 = arith.constant 0 : index
    %c0_7 = arith.constant 0 : index
    %10 = vector.load %arg4[%c0_6, %c0_7] : memref<128x128xbf16, #tpu.memory_space<vmem>>, vector<128x128xbf16>
    %cst_8 = arith.constant dense<0.000000e+00> : vector<2x128xf32>
    %11 = tpu.matmul %9, %10, %cst_8 {dimension_numbers = #tpu.dot_dimension_numbers<[1], [0], [0], [1], [0, 0, 1, 1], [], []>} : vector<2x128xbf16>, vector<128x128xbf16>, vector<2x128xf32> -> vector<2x128xf32>
    %c0_9 = arith.constant 0 : index
    %c0_10 = arith.constant 0 : index
    %12 = vector.load %arg5[%c0_9, %c0_10] : memref<1x128xf32, #tpu.memory_space<vmem>>, vector<1x128xf32>
    %13 = vector.broadcast %12 : vector<1x128xf32> to vector<2x128xf32>
    %14 = arith.addf %11, %13 : vector<2x128xf32>
    %cst_11 = arith.constant 0.000000e+00 : f32
    %15 = vector.broadcast %cst_11 : f32 to vector<2x128xf32>
    %16 = arith.maximumf %14, %15 : vector<2x128xf32>
    %17 = arith.truncf %16 : vector<2x128xf32> to vector<2x128xbf16>
    %c0_12 = arith.constant 0 : index
    %c0_13 = arith.constant 0 : index
    %18 = vector.load %arg6[%c0_12, %c0_13] : memref<128x128xbf16, #tpu.memory_space<vmem>>, vector<128x128xbf16>
    %cst_14 = arith.constant dense<0.000000e+00> : vector<2x128xf32>
    %19 = tpu.matmul %17, %18, %cst_14 {dimension_numbers = #tpu.dot_dimension_numbers<[1], [0], [0], [1], [0, 0, 1, 1], [], []>} : vector<2x128xbf16>, vector<128x128xbf16>, vector<2x128xf32> -> vector<2x128xf32>
    %c0_15 = arith.constant 0 : index
    %c0_16 = arith.constant 0 : index
    %20 = vector.load %arg7[%c0_15, %c0_16] : memref<1x128xf32, #tpu.memory_space<vmem>>, vector<1x128xf32>
    %21 = vector.broadcast %20 : vector<1x128xf32> to vector<2x128xf32>
    %22 = arith.addf %19, %21 : vector<2x128xf32>
    %cst_17 = arith.constant 0.000000e+00 : f32
    %23 = vector.broadcast %cst_17 : f32 to vector<2x128xf32>
    %24 = arith.maximumf %22, %23 : vector<2x128xf32>
    %25 = arith.truncf %24 : vector<2x128xf32> to vector<2x128xbf16>
    %c0_18 = arith.constant 0 : index
    %c0_19 = arith.constant 0 : index
    %26 = vector.load %arg8[%c0_18, %c0_19] : memref<128x128xbf16, #tpu.memory_space<vmem>>, vector<128x128xbf16>
    %cst_20 = arith.constant dense<0.000000e+00> : vector<2x128xf32>
    %27 = tpu.matmul %25, %26, %cst_20 {dimension_numbers = #tpu.dot_dimension_numbers<[1], [0], [0], [1], [0, 0, 1, 1], [], []>} : vector<2x128xbf16>, vector<128x128xbf16>, vector<2x128xf32> -> vector<2x128xf32>
    %c0_21 = arith.constant 0 : index
    %c0_22 = arith.constant 0 : index
    %28 = vector.load %arg9[%c0_21, %c0_22] : memref<1x128xf32, #tpu.memory_space<vmem>>, vector<1x128xf32>
    %29 = vector.broadcast %28 : vector<1x128xf32> to vector<2x128xf32>
    %30 = arith.addf %27, %29 : vector<2x128xf32>
    %31 = math.tanh %30 : vector<2x128xf32>
    %32 = arith.truncf %31 : vector<2x128xf32> to vector<2x128xbf16>
    %c0_23 = arith.constant 0 : index
    %c0_24 = arith.constant 0 : index
    %33 = vector.load %arg10[%c0_23, %c0_24] : memref<2x128xbf16, #tpu.memory_space<vmem>>, vector<2x128xbf16>
    tpu.vector_store %arg10[%c0_23, %c0_24], %32 {strides = array<i32>} : memref<2x128xbf16, #tpu.memory_space<vmem>>, vector<2x128xbf16>,
    return
  }
  func.func @transform_0(%arg0: i32) -> (i32, i32) {
    %c0_i32 = arith.constant 0 : i32
    %c0_i32_0 = arith.constant 0 : i32
    return %arg0, %c0_i32 : i32, i32
  }
  func.func @transform_1(%arg0: i32) -> (i32, i32) {
    %c0_i32 = arith.constant 0 : i32
    %c0_i32_0 = arith.constant 0 : i32
    %c0_i32_1 = arith.constant 0 : i32
    return %c0_i32, %c0_i32_0 : i32, i32
  }
  func.func @transform_2(%arg0: i32) -> (i32, i32) {
    %c0_i32 = arith.constant 0 : i32
    %c0_i32_0 = arith.constant 0 : i32
    %c0_i32_1 = arith.constant 0 : i32
    return %c0_i32, %c0_i32_0 : i32, i32
  }
  func.func @transform_3(%arg0: i32) -> (i32, i32) {
    %c0_i32 = arith.constant 0 : i32
    %c0_i32_0 = arith.constant 0 : i32
    %c0_i32_1 = arith.constant 0 : i32
    return %c0_i32, %c0_i32_0 : i32, i32
  }
  func.func @transform_4(%arg0: i32) -> (i32, i32) {
    %c0_i32 = arith.constant 0 : i32
    %c0_i32_0 = arith.constant 0 : i32
    %c0_i32_1 = arith.constant 0 : i32
    return %c0_i32, %c0_i32_0 : i32, i32
  }
  func.func @transform_5(%arg0: i32) -> (i32, i32) {
    %c0_i32 = arith.constant 0 : i32
    %c0_i32_0 = arith.constant 0 : i32
    %c0_i32_1 = arith.constant 0 : i32
    return %c0_i32, %c0_i32_0 : i32, i32
  }
  func.func @transform_6(%arg0: i32) -> (i32, i32) {
    %c0_i32 = arith.constant 0 : i32
    %c0_i32_0 = arith.constant 0 : i32
    %c0_i32_1 = arith.constant 0 : i32
    return %c0_i32, %c0_i32_0 : i32, i32
  }
  func.func @transform_7(%arg0: i32) -> (i32, i32) {
    %c0_i32 = arith.constant 0 : i32
    %c0_i32_0 = arith.constant 0 : i32
    %c0_i32_1 = arith.constant 0 : i32
    return %c0_i32, %c0_i32_0 : i32, i32
  }
  func.func @transform_8(%arg0: i32) -> (i32, i32) {
    %c0_i32 = arith.constant 0 : i32
    %c0_i32_0 = arith.constant 0 : i32
    %c0_i32_1 = arith.constant 0 : i32
    return %c0_i32, %c0_i32_0 : i32, i32
  }
  func.func @transform_9(%arg0: i32) -> (i32, i32) {
    %c0_i32 = arith.constant 0 : i32
    %c0_i32_0 = arith.constant 0 : i32
    return %arg0, %c0_i32 : i32, i32
  }
}

</mosaic_0001>

<bundles_post_ra>
// kernel: tpu_custom_call.1
= control target key start
LH: loop header
LB: loop body
LE: loop exit
PB: predicated region body
PF: predicated region fallthrough
CT: control target
= control target key end

     0   :  { %14 = vsyncpa [#allocation3], 0  ;;  %s1829_s0 = inlined_call_operand.hbm [shape: f32[2,1024], index: 0, kind: input, shape index: {}]   ;;  %s1830_s1 = inlined_call_operand.hbm [shape: bf16[1024,128], index: 1, kind: input, shape index: {}]   ;;  %s1831_s2 = inlined_call_operand.vmem [shape: f32[1,128], index: 2, kind: input, shape index: {}]   ;;  %s1832_s3 = inlined_call_operand.hbm [shape: bf16[128,128], index: 3, kind: input, shape index: {}]   ;;  %s1833_s4 = inlined_call_operand.vmem [shape: f32[1,128], index: 4, kind: input, shape index: {}]   ;;  %s1834_s5 = inlined_call_operand.hbm [shape: bf16[128,128], index: 5, kind: input, shape index: {}]   ;;  %s1835_s6 = inlined_call_operand.vmem [shape: f32[1,128], index: 6, kind: input, shape index: {}]   ;;  %s1836_s7 = inlined_call_operand.hbm [shape: bf16[128,128], index: 7, kind: input, shape index: {}]   ;;  %s1837_s8 = inlined_call_operand.vmem [shape: f32[1,128], index: 8, kind: input, shape index: {}]   ;;  %s1838_s9 = inlined_call_operand.hbm [shape: bf16[2,128], index: 9, kind: output, shape index: {}]  }
   0x1   :  { %15 = vsyncpa [#allocation6], 0 }
   0x2   :  { %16 = vsyncpa [#allocation9], 0 }
   0x3   :  { %17 = vsyncpa [#allocation4], 0  ;;  %s1690_s30 = smov [#allocation5]  }
   0x4   :  { %s33_s10 = sshll.u32 %s1690_s30, 4  ;;  %s34_s10 = int_to_ptr.vmem [resolvable:$true] %s33_s10 }
   0x5   :  { %s1570_s11 = scalar_lea.vmem %s34_s10, 8192  ;;  %p1575_p1 = scmp.lt.s32.totalorder %s34_s10, %s34_s10 }
   0x6   :  { %p1571_p0 = scmp.ne.s32.totalorder %s34_s10, %s1570_s11  ;;  %p1576_p2 = scmp.lt.s32.totalorder %s1570_s11, %s1570_s11 }
   0x8   :  { %p1577_p3 = por %p1576_p2, %p1575_p1 }
   0xa   :  { %p1578_p4 = pnand %p1577_p3, %p1571_p0 }
   0xc   :  { %1581 = shalt.err (!%p1578_p4)
}
   0xd   :  { %s1691_s12 = smov 64   ;;  %s1692_s13 = smov 4  }
   0xe   :  { %39 = dma.hbm_to_vmem [thread:$0]  %s1830_s1, 8192, %s34_s10, [#allocation6], %s1691_s12, %s1691_s12, %s1692_s13  }
   0xf   :  { %s1693_s16 = smov [#allocation8]   ;;  %s1694_s18 = smov [#allocation2]  }
  0x10   :  { %s61_s17 = sshll.u32 %s1693_s16, 4  ;;  %s24_s19 = sshll.u32 %s1694_s18, 4  ;;  %s62_s17 = int_to_ptr.vmem [resolvable:$true] %s61_s17  ;;  %s25_s19 = int_to_ptr.vmem [resolvable:$true] %s24_s19 }
  0x11   :  { %s1590_s20 = scalar_lea.vmem %s62_s17, 1024  ;;  %p1595_p6 = scmp.lt.s32.totalorder %s62_s17, %s62_s17 }
  0x12   :  { %p1591_p5 = scmp.ne.s32.totalorder %s62_s17, %s1590_s20  ;;  %p1596_p7 = scmp.lt.s32.totalorder %s1590_s20, %s1590_s20 }
  0x14   :  { %p1597_p8 = por %p1596_p7, %p1595_p6 }
  0x16   :  { %p1598_p9 = pnand %p1597_p8, %p1591_p5 }
  0x18   :  { %1601 = shalt.err (!%p1598_p9)
}
  0x19   :  { %67 = dma.hbm_to_vmem [thread:$0]  %s1834_s5, 1024, %s62_s17, [#allocation9], %s1691_s12, %s1691_s12, %s1692_s13  }
  0x1a   :  { %s1610_s1 = scalar_lea.vmem %s25_s19, 256  ;;  %p1615_p11 = scmp.lt.s32.totalorder %s25_s19, %s25_s19 }
  0x1b   :  { %p1611_p10 = scmp.ne.s32.totalorder %s25_s19, %s1610_s1  ;;  %p1616_p12 = scmp.lt.s32.totalorder %s1610_s1, %s1610_s1 }
  0x1d   :  { %p1617_p13 = por %p1616_p12, %p1615_p11 }
  0x1f   :  { %p1618_p0 = pnand %p1617_p13, %p1611_p10 }
  0x21   :  { %1621 = shalt.err (!%p1618_p0)
}
  0x22   :  { %27 = dma.hbm_to_vmem [thread:$0]  %s1829_s0, 256, %s25_s19, [#allocation3]  }
  0x23   :  { %s1695_s25 = smov [#allocation7]   ;;  %s1696_s27 = smov [#allocation10]  }
  0x24   :  { %s47_s26 = sshll.u32 %s1695_s25, 4  ;;  %s75_s28 = sshll.u32 %s1696_s27, 4  ;;  %s48_s26 = int_to_ptr.vmem [resolvable:$true] %s47_s26  ;;  %s76_s28 = int_to_ptr.vmem [resolvable:$true] %s75_s28 }
  0x25   :  { %s1630_s29 = scalar_lea.vmem %s48_s26, 1024  ;;  %p1635_p2 = scmp.lt.s32.totalorder %s48_s26, %s48_s26 }
  0x26   :  { %p1631_p1 = scmp.ne.s32.totalorder %s48_s26, %s1630_s29  ;;  %p1636_p3 = scmp.lt.s32.totalorder %s1630_s29, %s1630_s29 }
  0x28   :  { %p1637_p4 = por %p1636_p3, %p1635_p2 }
  0x2a   :  { %p1638_p5 = pnand %p1637_p4, %p1631_p1 }
  0x2c   :  { %1641 = shalt.err (!%p1638_p5)
}
  0x2d   :  { %53 = dma.hbm_to_vmem [thread:$0]  %s1832_s3, 1024, %s48_s26, [#allocation6], %s1691_s12, %s1691_s12, %s1692_s13  }
  0x2e   :  { %s1650_s0 = scalar_lea.vmem %s76_s28, 1024  ;;  %p1655_p7 = scmp.lt.s32.totalorder %s76_s28, %s76_s28 }
  0x2f   :  { %p1651_p6 = scmp.ne.s32.totalorder %s76_s28, %s1650_s0  ;;  %p1656_p8 = scmp.lt.s32.totalorder %s1650_s0, %s1650_s0 }
  0x31   :  { %p1657_p9 = por %p1656_p8, %p1655_p7 }
  0x33   :  { %p1658_p10 = pnand %p1657_p9, %p1651_p6 }
  0x35   :  { %1661 = shalt.err (!%p1658_p10)
}
  0x36   :  { %81 = dma.hbm_to_vmem [thread:$0]  %s1836_s7, 1024, %s76_s28, [#allocation9], %s1691_s12, %s1691_s12, %s1692_s13  }
  0x37   :  { %1682 = dma.done.wait [#allocation3], 256  }
  0x38   :  { %1683 = vsyncadd [#allocation3], 4294967040 }
  0x39   :  { %1684 = dma.done.wait [#allocation6], 9216  }
  0x3a   :  { %1685 = vsyncadd [#allocation6], 4294958080 }
  0x3b   :  { %1686 = dma.done.wait [#allocation9], 2048  }
  0x3c   :  { %1687 = vsyncadd [#allocation9], 4294965248  ;;  %v1470_v0 = vld [vmem:[#allocation5 + $0x78] sm:$0xff]   ;;  %v1474_v4 = vld [vmem:[#allocation5 + $0x70] sm:$0xff]   ;;  %v1697_v22 = vmov 1983009808   ;;  %v108_v24 = vlaneseq }
  0x3d   :  { %v1471_v1 = vld [vmem:[#allocation5 + $0xf8] sm:$0xff]   ;;  %1284 = vmatprep.subr.bf16.mxu0 %v1470_v0  ;;  %v1475_v5 = vld [vmem:[#allocation5 + $0xf0] sm:$0xff]   ;;  %v1478_v8 = vld [vmem:[#allocation5 + $0x68] sm:$0xff]   ;;  %v106_v23 = vunpack.c.l.s4 %v1697_v22  ;;  %vm1699_vm0 = vmmov 0   ;;  %s1700_s16 = smov [#allocation11]  }
  0x3e   :  { %v1472_v2 = vld [vmem:[#allocation5 + $0x38] sm:$0xff]   ;;  %1306 = vmatprep.subr.bf16.mxu1 %v1471_v1  ;;  %v1476_v6 = vld [vmem:[#allocation5 + $0x30] sm:$0xff]   ;;  %v1479_v9 = vld [vmem:[#allocation5 + $0xe8] sm:$0xff]   ;;  %v109_v30 = vshrl.u32 %v108_v24, 7 }
  0x3f   :  { %v1473_v3 = vld [vmem:[#allocation5 + $0xb8] sm:$0xff]   ;;  %1285 = vmatpush3.bf16.msra.mxu0 %v1472_v2  ;;  %v1477_v7 = vld [vmem:[#allocation5 + $0xb0] sm:$0xff]   ;;  %v1480_v10 = vld [vmem:[#allocation5 + $0x28] sm:$0xff]   ;;  %v107_v29 = vunpack.c.0.s8 %v106_v23 }
  0x40   :  { %1307 = vmatpush3.bf16.msra.mxu1 %v1473_v3  ;;  %1286 = vmatprep.subr.bf16.mxu0 %v1474_v4  ;;  %v1481_v11 = vld [vmem:[#allocation5 + $0xa8] sm:$0xff]   ;;  %v1482_v12 = vld [vmem:[#allocation5 + $0x60] sm:$0xff]   ;;  %v1486_v16 = vld [vmem:[#allocation5 + $0x58] sm:$0xff]  }
  0x41   :  { %1308 = vmatprep.subr.bf16.mxu1 %v1475_v5  ;;  %v1483_v13 = vld [vmem:[#allocation5 + $0xe0] sm:$0xff]   ;;  %v1487_v17 = vld [vmem:[#allocation5 + $0xd8] sm:$0xff]   ;;  %v1490_v20 = vld [vmem:[#allocation5 + $0x50] sm:$0xff]   ;;  %v1778_v35 = vsub.s32 %v107_v29, %v109_v30 }
  0x42   :  { %v1484_v14 = vld [vmem:[#allocation5 + $0x20] sm:$0xff]   ;;  %v1488_v18 = vld [vmem:[#allocation5 + $0x18] sm:$0xff]   ;;  %v1491_v21 = vld [vmem:[#allocation5 + $0xd0] sm:$0xff]  }
  0x43   :  { %1287 = vmatpush3.bf16.msra.mxu0 %v1476_v6  ;;  %v1485_v15 = vld [vmem:[#allocation5 + $0xa0] sm:$0xff]   ;;  %v1489_v19 = vld [vmem:[#allocation5 + $0x98] sm:$0xff]   ;;  %v1492_v25 = vld [vmem:[#allocation5 + $0x10] sm:$0xff]  }
  0x44   :  { %1309 = vmatpush3.bf16.msra.mxu1 %v1477_v7  ;;  %1288 = vmatprep.subr.bf16.mxu0 %v1478_v8  ;;  %v1493_v26 = vld [vmem:[#allocation5 + $0x90] sm:$0xff]   ;;  %v1494_v27 = vld [vmem:[#allocation5 + $0x48] sm:$0xff]   ;;  %v1498_v33 = vld [vmem:[#allocation5 + $0x40] sm:$0xff]  }
  0x45   :  { %1310 = vmatprep.subr.bf16.mxu1 %v1479_v9  ;;  %v1495_v28 = vld [vmem:[#allocation5 + $0xc8] sm:$0xff]   ;;  %v1499_v34 = vld [vmem:[#allocation5 + $0xc0] sm:$0xff]   ;;  %v100_v38 = vld [vmem:[#allocation2] sm:$0xff] }
  0x46   :  { %v1496_v31 = vld [vmem:[#allocation5 + $0x8] sm:$0xff]   ;;  %v1500_v36 = vld [vmem:[#allocation5] sm:$0xff]   ;;  %v111_v39 = vrot.slane %v100_v38, %v1778_v35  ;;  %v104_v40 = vcombine.high %v100_v38, %v100_v38  ;;  %v1503_v41 = vld [vmem:[#allocation5 + $0x178] sm:$0xff]  }
  0x47   :  { %1289 = vmatpush3.bf16.msra.mxu0 %v1480_v10  ;;  %v1497_v32 = vld [vmem:[#allocation5 + $0x88] sm:$0xff]   ;;  %v1501_v37 = vld [vmem:[#allocation5 + $0x80] sm:$0xff]   ;;  %v1504_v42 = vld [vmem:[#allocation5 + $0x1f8] sm:$0xff]  }
  0x48   :  { %1311 = vmatpush3.bf16.msra.mxu1 %v1481_v11  ;;  %1290 = vmatprep.subr.bf16.mxu0 %v1482_v12  ;;  %v119_v43 = vcombine.high %v111_v39, %v111_v39  ;;  %v118_v44 = vrot.slane %v104_v40, %v1778_v35  ;;  %v146_v45 = vpack.c.bf16 %v111_v39, %v111_v39  ;;  %v1505_v46 = vld [vmem:[#allocation5 + $0x138] sm:$0xff]   ;;  %v1507_v51 = vld [vmem:[#allocation5 + $0x170] sm:$0xff]   ;;  %v1511_v56 = vld [vmem:[#allocation5 + $0x168] sm:$0xff]  }
  0x49   :  { %1312 = vmatprep.subr.bf16.mxu1 %v1483_v13  ;;  %v1506_v49 = vld [vmem:[#allocation5 + $0x1b8] sm:$0xff]   ;;  %v1508_v53 = vld [vmem:[#allocation5 + $0x1f0] sm:$0xff]   ;;  %v1512_v57 = vld [vmem:[#allocation5 + $0x1e8] sm:$0xff]  }
  0x4a   :  { %v147_v47 = vpack.c.bf16 %v119_v43, %v119_v43  ;;  %v120_v48 = vcombine.high %v118_v44, %v118_v44  ;;  %v148_v50 = vpack.c.bf16 %v118_v44, %v118_v44  ;;  %v1509_v54 = vld [vmem:[#allocation5 + $0x130] sm:$0xff]   ;;  %v1513_v58 = vld [vmem:[#allocation5 + $0x128] sm:$0xff]   ;;  %v1515_v60 = vld [vmem:[#allocation5 + $0x160] sm:$0xff]  }
  0x4b   :  { %1291 = vmatpush3.bf16.msra.mxu0 %v1484_v14  ;;  %v1510_v55 = vld [vmem:[#allocation5 + $0x1b0] sm:$0xff]   ;;  %v1514_v59 = vld [vmem:[#allocation5 + $0x1a8] sm:$0xff]   ;;  %v1516_v61 = vld [vmem:[#allocation5 + $0x1e0] sm:$0xff]  }
  0x4c   :  { %1313 = vmatpush3.bf16.msra.mxu1 %v1485_v15  ;;  %1292 = vmatprep.subr.bf16.mxu0 %v1486_v16  ;;  %v149_v52 = vpack.c.bf16 %v120_v48, %v120_v48  ;;  %v1517_v62 = vld [vmem:[#allocation5 + $0x120] sm:$0xff]   ;;  %v1519_v0 = vld [vmem:[#allocation5 + $0x158] sm:$0xff]   ;;  %v1523_v4 = vld [vmem:[#allocation5 + $0x150] sm:$0xff]  }
  0x4d   :  { %1314 = vmatprep.subr.bf16.mxu1 %v1487_v17  ;;  %705 = vmatprep.mubr.bf16.mxu0 %v147_v47  ;;  %v1518_v63 = vld [vmem:[#allocation5 + $0x1a0] sm:$0xff]   ;;  %v1520_v1 = vld [vmem:[#allocation5 + $0x1d8] sm:$0xff]   ;;  %v1524_v5 = vld [vmem:[#allocation5 + $0x1d0] sm:$0xff]  }
  0x4e   :  { %745 = vmatprep.mubr.bf16.mxu1 %v149_v52  ;;  %v1521_v2 = vld [vmem:[#allocation5 + $0x118] sm:$0xff]   ;;  %v1525_v6 = vld [vmem:[#allocation5 + $0x110] sm:$0xff]   ;;  %v1527_v8 = vld [vmem:[#allocation5 + $0x148] sm:$0xff]  }
  0x4f   :  { %1293 = vmatpush3.bf16.msra.mxu0 %v1488_v18  ;;  %v1522_v3 = vld [vmem:[#allocation5 + $0x198] sm:$0xff]   ;;  %v1526_v7 = vld [vmem:[#allocation5 + $0x190] sm:$0xff]   ;;  %v1528_v9 = vld [vmem:[#allocation5 + $0x1c8] sm:$0xff]  }
  0x50   :  { %1315 = vmatpush3.bf16.msra.mxu1 %v1489_v19  ;;  %1294 = vmatprep.subr.bf16.mxu0 %v1490_v20  ;;  %v1529_v10 = vld [vmem:[#allocation5 + $0x108] sm:$0xff]   ;;  %v1531_v12 = vld [vmem:[#allocation5 + $0x140] sm:$0xff]   ;;  %v101_v15 = vld [vmem:[#allocation2 + $0x8] sm:$0xff] }
  0x51   :  { %1316 = vmatprep.subr.bf16.mxu1 %v1491_v21  ;;  %v1530_v11 = vld [vmem:[#allocation5 + $0x188] sm:$0xff]   ;;  %v1532_v13 = vld [vmem:[#allocation5 + $0x1c0] sm:$0xff]   ;;  %v128_v17 = vrot.slane %v101_v15, %v1778_v35  ;;  %v121_v18 = vcombine.high %v101_v15, %v101_v15  ;;  %v1548_v39 = vld [vmem:[#allocation8 + $0x18] sm:$0xff]  }
  0x52   :  { %v1533_v14 = vld [vmem:[#allocation5 + $0x100] sm:$0xff]   ;;  %v1538_v29 = vld [vmem:[#allocation7 + $0x28] sm:$0xff]   ;;  %v1549_v40 = vld [vmem:[#allocation8 + $0x10] sm:$0xff]  }
  0x53   :  { %1295 = vmatpush3.bf16.msra.mxu0 %v1492_v25  ;;  %v1534_v16 = vld [vmem:[#allocation5 + $0x180] sm:$0xff]   ;;  %v136_v19 = vcombine.high %v128_v17, %v128_v17  ;;  %v135_v20 = vrot.slane %v121_v18, %v1778_v35  ;;  %v150_v21 = vpack.c.bf16 %v128_v17, %v128_v17  ;;  %v1544_v35 = vld [vmem:[#allocation8 + $0x38] sm:$0xff]  }
  0x54   :  { %1317 = vmatpush3.bf16.msra.mxu1 %v1493_v26  ;;  %1296 = vmatprep.subr.bf16.mxu0 %v1494_v27  ;;  %v1536_v26 = vld [vmem:[#allocation7 + $0x38] sm:$0xff]   ;;  %v1698_v27 = vmov 0.0   ;;  %v1539_v30 = vld [vmem:[#allocation7 + $0x20] sm:$0xff]  }
  0x55   :  { %1318 = vmatprep.subr.bf16.mxu1 %v1495_v28  ;;  %v151_v22 = vpack.c.bf16 %v136_v19, %v136_v19  ;;  %v137_v23 = vcombine.high %v135_v20, %v135_v20  ;;  %v152_v24 = vpack.c.bf16 %v135_v20, %v135_v20  ;;  %v1537_v28 = vld [vmem:[#allocation7 + $0x30] sm:$0xff]   ;;  %v1547_v38 = vld [vmem:[#allocation8 + $0x20] sm:$0xff]   ;;  %v1558_v20 = vld [vmem:[#allocation10 + $0x8] sm:$0xff]  }
  0x57   :  { %1297 = vmatpush3.bf16.msra.mxu0 %v1496_v31  ;;  %v153_v25 = vpack.c.bf16 %v137_v23, %v137_v23  ;;  %v1540_v31 = vld [vmem:[#allocation7 + $0x18] sm:$0xff]  }
  0x58   :  { %1319 = vmatpush3.bf16.msra.mxu1 %v1497_v32  ;;  %1298 = vmatprep.subr.bf16.mxu0 %v1498_v33  ;;  %v1541_v32 = vld [vmem:[#allocation7 + $0x10] sm:$0xff]   ;;  %v1542_v33 = vld [vmem:[#allocation7 + $0x8] sm:$0xff]  }
  0x59   :  { %1320 = vmatprep.subr.bf16.mxu1 %v1499_v34  ;;  %v1543_v34 = vld [vmem:[#allocation7] sm:$0xff]  }
  0x5b   :  { %1299 = vmatpush3.bf16.msra.mxu0 %v1500_v36  ;;  %v1545_v36 = vld [vmem:[#allocation8 + $0x30] sm:$0xff]  }
  0x5c   :  { %1321 = vmatpush3.bf16.msra.mxu1 %v1501_v37  ;;  %1328 = vmatprep.subr.bf16.mxu0 %v1503_v41  ;;  %v1546_v37 = vld [vmem:[#allocation8 + $0x28] sm:$0xff]  }
  0x5d   :  { %1350 = vmatprep.subr.bf16.mxu1 %v1504_v42 }
  0x5e   :  { %706 = vmatmul.mubr.bf16.vlgmr.msra.gmra.mxu0 %v146_v45 }
  0x5f   :  { %1329 = vmatpush3.bf16.msra.mxu0 %v1505_v46  ;;  %746 = vmatmul.mubr.bf16.vlgmr.msra.gmra.mxu1 %v148_v50  ;;  %v1192_v50 = vld [vmem:[%s1831_s2] ss:$0 sm:$0xff] }
  0x60   :  { %1330 = vmatprep.subr.bf16.mxu0 %v1507_v51  ;;  %1351 = vmatpush3.bf16.msra.mxu1 %v1506_v49 }
  0x61   :  { %1352 = vmatprep.subr.bf16.mxu1 %v1508_v53  ;;  %785 = vmatprep.mubr.bf16.mxu0 %v151_v22  ;;  %v1266_v22 = vld [vmem:[%s1835_s6] ss:$0 sm:$0xff]  ;;  %s1181_s6 = sshll.u32 %s1700_s16, 4  ;;  %s1182_s6 = int_to_ptr.vmem [resolvable:$true] %s1181_s6 }
  0x62   :  { %825 = vmatprep.mubr.bf16.mxu1 %v153_v25  ;;  %s1662_s17 = scalar_lea.vmem %s1182_s6, 16  ;;  %s1666_s18 = scalar_lea.vmem %s1182_s6, 32 }
  0x63   :  { %1331 = vmatpush3.bf16.msra.mxu0 %v1509_v54  ;;  %p1663_p11 = scmp.ne.s32.totalorder %s1182_s6, %s1662_s17  ;;  %p1667_p12 = scmp.lt.s32.totalorder %s1182_s6, %s1182_s6 }
  0x64   :  { %1332 = vmatprep.subr.bf16.mxu0 %v1511_v56  ;;  %1353 = vmatpush3.bf16.msra.mxu1 %v1510_v55  ;;  %p1668_p13 = scmp.lt.s32.totalorder %s1666_s18, %s1662_s17 }
  0x65   :  { %1354 = vmatprep.subr.bf16.mxu1 %v1512_v57 }
  0x66   :  { %p1669_p0 = por %p1668_p13, %p1667_p12 }
  0x67   :  { %1333 = vmatpush3.bf16.msra.mxu0 %v1513_v58 }
  0x68   :  { %1334 = vmatprep.subr.bf16.mxu0 %v1515_v60  ;;  %1355 = vmatpush3.bf16.msra.mxu1 %v1514_v59  ;;  %p1670_p1 = pnand %p1669_p0, %p1663_p11 }
  0x69   :  { %1356 = vmatprep.subr.bf16.mxu1 %v1516_v61 }
  0x6b   :  { %1335 = vmatpush3.bf16.msra.mxu0 %v1517_v62 }
  0x6c   :  { %1336 = vmatprep.subr.bf16.mxu0 %v1519_v0  ;;  %1357 = vmatpush3.bf16.msra.mxu1 %v1518_v63 }
  0x6d   :  { %1358 = vmatprep.subr.bf16.mxu1 %v1520_v1 }
  0x6f   :  { %1337 = vmatpush3.bf16.msra.mxu0 %v1521_v2 }
  0x70   :  { %1338 = vmatprep.subr.bf16.mxu0 %v1523_v4  ;;  %1359 = vmatpush3.bf16.msra.mxu1 %v1522_v3  ;;  %v1550_v4 = vld [vmem:[#allocation8 + $0x8] sm:$0xff]  }
  0x71   :  { %1360 = vmatprep.subr.bf16.mxu1 %v1524_v5  ;;  %v1551_v5 = vld [vmem:[#allocation8] sm:$0xff]  }
  0x73   :  { %1339 = vmatpush3.bf16.msra.mxu0 %v1525_v6  ;;  %v1552_v6 = vld [vmem:[#allocation10 + $0x38] sm:$0xff]  }
  0x74   :  { %1340 = vmatprep.subr.bf16.mxu0 %v1527_v8  ;;  %1361 = vmatpush3.bf16.msra.mxu1 %v1526_v7  ;;  %v1553_v7 = vld [vmem:[#allocation10 + $0x30] sm:$0xff]   ;;  %v1554_v8 = vld [vmem:[#allocation10 + $0x28] sm:$0xff]  }
  0x75   :  { %1362 = vmatprep.subr.bf16.mxu1 %v1528_v9  ;;  %v1555_v9 = vld [vmem:[#allocation10 + $0x20] sm:$0xff]  }
  0x77   :  { %1341 = vmatpush3.bf16.msra.mxu0 %v1529_v10  ;;  %v1556_v10 = vld [vmem:[#allocation10 + $0x18] sm:$0xff]  }
  0x78   :  { %1342 = vmatprep.subr.bf16.mxu0 %v1531_v12  ;;  %1363 = vmatpush3.bf16.msra.mxu1 %v1530_v11  ;;  %v1557_v11 = vld [vmem:[#allocation10 + $0x10] sm:$0xff]  }
  0x79   :  { %1364 = vmatprep.subr.bf16.mxu1 %v1532_v13  ;;  %v1257_v12 = vld [vmem:[%s1833_s4] ss:$0 sm:$0xff] }
  0x7b   :  { %1343 = vmatpush3.bf16.msra.mxu0 %v1533_v14 }
  0x7c   :  { %1365 = vmatpush3.bf16.msra.mxu1 %v1534_v16  ;;  %1399 = vmatprep.subr.bf16.mxu0 %v1698_v27 }
  0x7d   :  { %1419 = vmatprep.subr.bf16.mxu1 %v1698_v27 }
  0x7e   :  { %786 = vmatmul.mubr.bf16.vlgmr.msra.gmra.mxu0 %v150_v21  ;;  %v1559_v21 = vld [vmem:[#allocation10] sm:$0xff]  }
  0x7f   :  { %826 = vmatmul.mubr.bf16.vlgmr.msra.gmra.mxu1 %v152_v24  ;;  %1400 = vmatpush3.bf16.msra.mxu0 %v1536_v26 }
  0x80   :  { %1401 = vmatprep.subr.bf16.mxu0 %v1698_v27  ;;  %1415 = vmatprep.mubr.msk.bf16.mxu0 %vm1699_vm0, %v1698_v27 }
  0x81   :  { %1435 = vmatprep.mubr.msk.bf16.mxu1 %vm1699_vm0, %v1698_v27  ;;  %1420 = vmatpush3.bf16.msra.mxu1 %v1544_v35 }
  0x82   :  { %1421 = vmatprep.subr.bf16.mxu1 %v1698_v27 }
  0x83   :  { %1402 = vmatpush3.bf16.msra.mxu0 %v1537_v28 }
  0x84   :  { %1403 = vmatprep.subr.bf16.mxu0 %v1698_v27 }
  0x85   :  { %1422 = vmatpush3.bf16.msra.mxu1 %v1545_v36 }
  0x86   :  { %1423 = vmatprep.subr.bf16.mxu1 %v1698_v27 }
  0x87   :  { %1404 = vmatpush3.bf16.msra.mxu0 %v1538_v29 }
  0x88   :  { %1405 = vmatprep.subr.bf16.mxu0 %v1698_v27 }
  0x89   :  { %1424 = vmatpush3.bf16.msra.mxu1 %v1546_v37 }
  0x8a   :  { %1425 = vmatprep.subr.bf16.mxu1 %v1698_v27 }
  0x8b   :  { %1406 = vmatpush3.bf16.msra.mxu0 %v1539_v30 }
  0x8c   :  { %1407 = vmatprep.subr.bf16.mxu0 %v1698_v27 }
  0x8d   :  { %1426 = vmatpush3.bf16.msra.mxu1 %v1547_v38 }
  0x8e   :  { %1427 = vmatprep.subr.bf16.mxu1 %v1698_v27 }
  0x8f   :  { %1408 = vmatpush3.bf16.msra.mxu0 %v1540_v31  ;;  %v1275_v31 = vld [vmem:[%s1837_s8] ss:$0 sm:$0xff] }
  0x90   :  { %1409 = vmatprep.subr.bf16.mxu0 %v1698_v27 }
  0x91   :  { %1428 = vmatpush3.bf16.msra.mxu1 %v1548_v39 }
  0x92   :  { %1429 = vmatprep.subr.bf16.mxu1 %v1698_v27 }
  0x93   :  { %1410 = vmatpush3.bf16.msra.mxu0 %v1541_v32 }
  0x94   :  { %1411 = vmatprep.subr.bf16.mxu0 %v1698_v27 }
  0x95   :  { %1430 = vmatpush3.bf16.msra.mxu1 %v1549_v40 }
  0x96   :  { %1431 = vmatprep.subr.bf16.mxu1 %v1698_v27 }
  0x97   :  { %1412 = vmatpush3.bf16.msra.mxu0 %v1542_v33 }
  0x98   :  { %1413 = vmatprep.subr.bf16.mxu0 %v1698_v27 }
  0x99   :  { %1432 = vmatpush3.bf16.msra.mxu1 %v1550_v4 }
  0x9a   :  { %1433 = vmatprep.subr.bf16.mxu1 %v1698_v27 }
  0x9b   :  { %1414 = vmatpush3.bf16.msra.mxu0 %v1543_v34 }
  0x9c   :  { %1439 = vmatprep.subr.bf16.mxu0 %v1698_v27 }
  0x9d   :  { %1434 = vmatpush3.bf16.msra.mxu1 %v1551_v5 }
 0x11e   :  { %v1300_v41 = vpop.f32.mrf.mxu0 }
 0x11f   :  { %v1322_v42 = vpop.f32.mrf.mxu1 }
 0x120   :  { %v1301_v43 = vpop.f32.mrf.mxu0 }
 0x121   :  { %v1323_v44 = vpop.f32.mrf.mxu1  ;;  %v1302_v49 = vadd.f32 %v1301_v43, %v1300_v41 }
 0x122   :  { %v1303_v45 = vpop.f32.mrf.mxu0  ;;  %v1324_v52 = vadd.f32 %v1323_v44, %v1322_v42 }
 0x123   :  { %v1325_v46 = vpop.f32.mrf.mxu1  ;;  %v708_v51 = vadd.f32 %v1302_v49, %v1192_v50 }
 0x124   :  { %v1304_v47 = vpop.f32.mrf.mxu0 }
 0x125   :  { %v1326_v48 = vpop.f32.mrf.mxu1  ;;  %v748_v56 = vadd.f32 %v1324_v52, %v708_v51 }
 0x13e   :  { %v1344_v53 = vpop.f32.mrf.mxu0 }
 0x13f   :  { %v1366_v54 = vpop.f32.mrf.mxu1 }
 0x140   :  { %v1345_v55 = vpop.f32.mrf.mxu0 }
 0x141   :  { %v1346_v57 = vadd.f32 %v1345_v55, %v1344_v53  ;;  %v1367_v58 = vpop.f32.mrf.mxu1 }
 0x142   :  { %v1347_v59 = vpop.f32.mrf.mxu0  ;;  %v1368_v61 = vadd.f32 %v1367_v58, %v1366_v54 }
 0x143   :  { %v788_v60 = vadd.f32 %v1346_v57, %v748_v56  ;;  %v1369_v62 = vpop.f32.mrf.mxu1 }
 0x144   :  { %v1348_v63 = vpop.f32.mrf.mxu0 }
 0x145   :  { %v828_v0 = vadd.f32 %v1368_v61, %v788_v60  ;;  %v1370_v1 = vpop.f32.mrf.mxu1 }
 0x147   :  { %v833_v2 = vmax.f32 %v828_v0, 0.0 }
 0x149   :  { %v834_v3 = vpack.c.bf16 %v833_v2, %v833_v2 }
 0x14b   :  { %1416 = vmatmul.mubr.bf16.vlgmr.msra.gmra.mxu0 %v834_v3 }
 0x14c   :  { %1455 = vmatprep.mubr.msk.bf16.mxu0 %vm1699_vm0, %v1698_v27  ;;  %1440 = vmatpush3.bf16.msra.mxu0 %v1552_v6 }
 0x14d   :  { %1441 = vmatprep.subr.bf16.mxu0 %v1698_v27 }
 0x150   :  { %1442 = vmatpush3.bf16.msra.mxu0 %v1553_v7 }
 0x151   :  { %1443 = vmatprep.subr.bf16.mxu0 %v1698_v27 }
 0x154   :  { %1444 = vmatpush3.bf16.msra.mxu0 %v1554_v8 }
 0x155   :  { %1445 = vmatprep.subr.bf16.mxu0 %v1698_v27 }
 0x158   :  { %1446 = vmatpush3.bf16.msra.mxu0 %v1555_v9 }
 0x159   :  { %1447 = vmatprep.subr.bf16.mxu0 %v1698_v27 }
 0x15c   :  { %1448 = vmatpush3.bf16.msra.mxu0 %v1556_v10 }
 0x15d   :  { %1449 = vmatprep.subr.bf16.mxu0 %v1698_v27 }
 0x160   :  { %1450 = vmatpush3.bf16.msra.mxu0 %v1557_v11 }
 0x161   :  { %1451 = vmatprep.subr.bf16.mxu0 %v1698_v27 }
 0x164   :  { %1452 = vmatpush3.bf16.msra.mxu0 %v1558_v20 }
 0x165   :  { %1453 = vmatprep.subr.bf16.mxu0 %v1698_v27 }
 0x168   :  { %1454 = vmatpush3.bf16.msra.mxu0 %v1559_v21 }
 0x20b   :  { %v940_v13 = vpop.f32.mrf.mxu0 }
 0x20c   :  { %v941_v14 = vadd.f32 %v1257_v12, %v940_v13 }
 0x20d   :  { %v1417_v15 = vpop.f32.mrf.mxu0 }
 0x20e   :  { %v946_v16 = vmax.f32 %v941_v14, 0.0 }
 0x20f   :  { %v943_v17 = vpop.f32.mrf.mxu0 }
 0x210   :  { %v947_v18 = vpack.c.bf16 %v946_v16, %v946_v16 }
 0x211   :  { %v1418_v19 = vpop.f32.mrf.mxu0 }
 0x212   :  { %1436 = vmatmul.mubr.bf16.vlgmr.msra.gmra.mxu1 %v947_v18 }
 0x2d2   :  { %v1053_v23 = vpop.f32.mrf.mxu1 }
 0x2d3   :  { %v1054_v24 = vadd.f32 %v1266_v22, %v1053_v23 }
 0x2d4   :  { %v1437_v25 = vpop.f32.mrf.mxu1 }
 0x2d5   :  { %v1059_v26 = vmax.f32 %v1054_v24, 0.0 }
 0x2d6   :  { %v1056_v28 = vpop.f32.mrf.mxu1 }
 0x2d7   :  { %v1060_v29 = vpack.c.bf16 %v1059_v26, %v1059_v26 }
 0x2d8   :  { %v1438_v30 = vpop.f32.mrf.mxu1 }
 0x2d9   :  { %1456 = vmatmul.mubr.bf16.vlgmr.msra.gmra.mxu0 %v1060_v29 }
 0x399   :  { %v1166_v32 = vpop.f32.mrf.mxu0 }
 0x39a   :  { %v1167_v27 = vadd.f32 %v1275_v31, %v1166_v32 }
 0x39b   :  { %v1457_v33 = vpop.f32.mrf.mxu0 }
 0x39c   :  { %1560 = vtanh.f32 %v1167_v27 }
 0x39d   :  { %v1169_v34 = vpop.f32.mrf.mxu0 }
 0x39f   :  { %v1458_v35 = vpop.f32.mrf.mxu0 }
 0x3a9   :  { %v1561_v36 = vpop.eup %1560 }
 0x3aa   :  { %v1173_v37 = vpack.c.bf16 %v1561_v36, %v1561_v36 }
 0x3ac   :  { %1174 = vst [vmem:[#allocation11] sm:$0x1] %v1173_v37 }
 0x3ad   :  { %1673 = shalt.err (!%p1670_p1)
}
 0x3ae   :  { %1184 = dma.vmem_to_hbm [thread:$0]  %s1182_s6, 16, %s1838_s9, [#allocation4]  }
 0x3af   :  { %1688 = dma.done.wait [#allocation4], 16  }
 0x3b0   :  { %1689 = vsyncadd [#allocation4], 4294967280 }
 0x3b1   :  { %1188 = vsyncpa [#allocation3], 1 }
 0x3b2   :  { %1189 = vsyncpa [#allocation6], 1 }
 0x3b3   :  { %1190 = vsyncpa [#allocation9], 1 }
 0x3b4   :  { %1191 = vsyncpa [#allocation4], 1 }

</bundles_post_ra>
